<compile_context>
chip_gen: v6e
topology: v6e:2x2x1
jax: 0.10.0
libtpu: 0.0.40
codegen_flags: <defaults>
</compile_context>

<pallas_src>
import functools
import math

import jax
import jax.numpy as jnp
from jax import lax
from jax.experimental import pallas as pl
from jax.experimental.pallas import tpu as pltpu


def _choose_band(H, Wp, target_lanes=8192):
    """Output rows per band.

    When banding (n_bands > 1) the output tile's lane extent band_h * Wp must
    be a multiple of 128 (Mosaic block-shape rule).  A single band uses the
    full-dim exception instead, so arbitrary H*Wp stays legal."""
    unit = 128 // math.gcd(Wp, 128)          # smallest band_h with band_h*Wp % 128 == 0
    if unit >= H:
        return H, 1
    k = max(1, target_lanes // (unit * Wp))
    band_h = unit * k
    n_bands = -(-H // band_h)
    if n_bands <= 1:
        return H, 1
    return band_h, n_bands


def grid_feature_conv2d(x_nchw, weight_oihw, bias, *, kernel_size):
    """Equivalent of GridFeatureConv2d.forward's self.conv(plane_view).

    x_nchw:      (N, Cin*D, H, W)        float32, PyTorch NCHW layout
    weight_oihw: (Cout*D, Cin*D, K, K)   PyTorch Conv2d weight layout
    bias:        (Cout*D,)
    Returns:     (N, Cout*D, H, W)       NCHW, stride=1, padding=(K-1)//2
    """
    N, cin, H, W = x_nchw.shape
    K = kernel_size
    assert K % 2 == 1, "only odd kernel_size ('same' padding) is supported"
    p = (K - 1) // 2
    cout = weight_oihw.shape[0]
    Wp = W + 2 * p

    band_h, n_bands = _choose_band(H, Wp)
    H_pad = band_h * n_bands
    TM = band_h * Wp                       # output positions per grid step (lane axis)
    Lb = (band_h + 2 * p) * Wp + 2 * p     # band length: halo rows + wrap tail

    # ---- wrapper-side layout glue (cheap, ~1x input bytes) -----------------
    # Cast to bf16 BEFORE padding/banding so every wrapper pass moves half the
    # bytes.  NCHW is already channels-major: no transpose needed at all.
    x_bf = x_nchw.astype(jnp.bfloat16)
    x_p = jnp.pad(x_bf, ((0, 0), (0, 0), (p, (H_pad - H) + p), (p, p)))
    if n_bands == 1:
        x_bands = x_p.reshape(N, 1, cin, (band_h + 2 * p) * Wp)
    else:
        # Row bands with a 2p-row halo (tiny duplication, replaces the 9x slab).
        x_bands = jnp.stack(
            [x_p[:, :, b * band_h: b * band_h + band_h + 2 * p, :]
             for b in range(n_bands)],
            axis=1,
        ).reshape(N, n_bands, cin, (band_h + 2 * p) * Wp)
    # 2p-zero tail so the flattened tap shift of the (discarded) last junk
    # columns stays in bounds.
    x_bands = jnp.pad(x_bands, ((0, 0), (0, 0), (0, 0), (0, 2 * p)))

    # Weights (Cout, Cin, K, K) -> (K*K, Cout, Cin): w_taps[kh*K+kw] is the
    # (Cout, Cin) tap matrix.  Tiny; stays VMEM-resident across the grid.
    w_taps = jnp.transpose(weight_oihw, (2, 3, 0, 1)).reshape(K * K, cout, cin)
    w_taps = w_taps.astype(jnp.bfloat16)
    b2 = bias.reshape(cout, 1).astype(jnp.float32)
    assert K * K * cout * cin * 2 + cout * 4 < (1 << 22), \
        "weights/bias assumed VMEM-resident"

    # ---- fused conv kernel: in-kernel im2col via shifted VMEM slices -------
    def conv_band_kernel(w_ref, x_ref, b_ref, o_ref):
        # w_ref: (K*K, Cout, Cin) bf16   x_ref: (Cin, Lb) bf16
        # b_ref: (Cout, 1) f32           o_ref: (Cout, TM) f32
        acc = jnp.zeros(o_ref.shape, jnp.float32)
        for kh in range(K):
            for kw in range(K):
                off = kh * Wp + kw                      # static flat tap shift
                x_tap = x_ref[:, off:off + TM]          # (Cin, TM), VMEM re-read
                acc += jnp.dot(w_ref[kh * K + kw], x_tap,
                               preferred_element_type=jnp.float32)
        o_ref[...] = (acc + b_ref[...]).astype(o_ref.dtype)

    out_flat = pl.pallas_call(
        conv_band_kernel,
        out_shape=jax.ShapeDtypeStruct((N, cout, H_pad * Wp), jnp.float32),
        grid_spec=pltpu.PrefetchScalarGridSpec(
            num_scalar_prefetch=0,
            grid=(N, n_bands),
            in_specs=[
                pl.BlockSpec((K * K, cout, cin), lambda n, b: (0, 0, 0)),       # weights
                pl.BlockSpec((None, None, cin, Lb), lambda n, b: (n, b, 0, 0)),  # band
                pl.BlockSpec((cout, 1), lambda n, b: (0, 0)),                    # bias
            ],
            out_specs=pl.BlockSpec((None, cout, TM), lambda n, b: (n, 0, b)),
        ),
        compiler_params=pltpu.CompilerParams(
            dimension_semantics=("parallel", "parallel"),
            vmem_limit_bytes=32 * 1024 * 1024,   # explicit: safe on v7x (64 MiB part)
        ),
    )(w_taps, x_bands, b2)

    # (N, Cout, H_pad*Wp) -> NCHW; drop the pad columns / extra band rows.
    out = out_flat.reshape(N, cout, H_pad, Wp)[:, :, :H, :W]
    return out.astype(x_nchw.dtype)


if __name__ == "__main__":
    # GridFeatureConv2d(in_channels=4, out_channels=4, kernel_size=3,
    #                   compressed_spatial_dim=2)
    #   -> nn.Conv2d(8, 8, kernel_size=3, stride=1, padding=1, bias=True)
    in_channels, out_channels = 4, 4
    compressed_spatial_dim = 2
    K = 3
    cin = in_channels * compressed_spatial_dim          # 8
    cout = out_channels * compressed_spatial_dim        # 8
    N, H, W = 2, 16, 16

    key = jax.random.PRNGKey(0)
    kx, kwt, kb = jax.random.split(key, 3)

    x = jax.random.normal(kx, (N, cin, H, W), jnp.float32)

    # Deterministic synthetic init (PyTorch-style uniform bound 1/sqrt(fan_in)).
    fan_in = cin * K * K
    bound = 1.0 / float(fan_in) ** 0.5
    weight = jax.random.uniform(kwt, (cout, cin, K, K), jnp.float32,
                                minval=-bound, maxval=bound)
    bias = jax.random.uniform(kb, (cout,), jnp.float32,
                              minval=-bound, maxval=bound)

    conv = jax.jit(functools.partial(grid_feature_conv2d, kernel_size=K))
    out = conv(x, weight, bias)
    out = jax.block_until_ready(out)
    assert out.shape == (N, cout, H, W)

    # Cross-check against XLA's conv with the same bf16-quantized operands
    # (f32 accumulation in both); padding derived from K, not hard-coded.
    p = (K - 1) // 2
    x_q = x.astype(jnp.bfloat16).astype(jnp.float32)
    w_q = weight.astype(jnp.bfloat16).astype(jnp.float32)
    ref = lax.conv_general_dilated(
        x_q, w_q, window_strides=(1, 1),
        padding=((p, p), (p, p)),
        dimension_numbers=("NCHW", "OIHW", "NCHW"),
    ) + bias[None, :, None, None]
    assert jnp.allclose(out, ref, atol=2e-3, rtol=2e-3), "mismatch vs reference"

    print("KERNEL_OK")
</pallas_src>

<mosaic_0001>
module attributes {stable_mosaic.version = 11 : i64} {
  func.func @conv_band_kernel(%arg0: i32, %arg1: i32, %arg2: memref<9x8x8xbf16, #tpu.memory_space<vmem>>, %arg3: memref<1x1x8x326xbf16, #tpu.memory_space<vmem>>, %arg4: memref<8x1xf32, #tpu.memory_space<vmem>>, %arg5: memref<1x8x288xf32, #tpu.memory_space<vmem>>) attributes {dimension_semantics = [#tpu.dimension_semantics<parallel>, #tpu.dimension_semantics<parallel>], iteration_bounds = array<i64: 2, 1>, scalar_prefetch = 0 : i64, scratch_operands = 0 : i64, tpu.core_type = #tpu.core_type<tc>, window_params = [{pipeline_mode = #tpu.pipeline_mode<synchronous>, transform_indices = @transform_0, window_bounds = array<i64: 9, 8, 8>}, {transform_indices = @transform_1, window_bounds = array<i64: 1, 1, 8, 326>}, {pipeline_mode = #tpu.pipeline_mode<synchronous>, transform_indices = @transform_2, window_bounds = array<i64: 8, 1>}, {transform_indices = @transform_3, window_bounds = array<i64: 1, 8, 288>}]} {
    %cst = arith.constant 0.000000e+00 : f32
    %0 = vector.broadcast %cst : f32 to vector<8x288xf32>
    %c0 = arith.constant 0 : index
    %c0_0 = arith.constant 0 : index
    %c0_1 = arith.constant 0 : index
    %c0_2 = arith.constant 0 : index
    %1 = vector.load %arg3[%c0, %c0_0, %c0_1, %c0_2] : memref<1x1x8x326xbf16, #tpu.memory_space<vmem>>, vector<1x1x8x288xbf16>
    %2 = vector.shape_cast %1 : vector<1x1x8x288xbf16> to vector<8x288xbf16>
    %c0_3 = arith.constant 0 : index
    %c0_4 = arith.constant 0 : index
    %c0_5 = arith.constant 0 : index
    %3 = vector.load %arg2[%c0_3, %c0_4, %c0_5] : memref<9x8x8xbf16, #tpu.memory_space<vmem>>, vector<1x8x8xbf16>
    %4 = vector.shape_cast %3 : vector<1x8x8xbf16> to vector<8x8xbf16>
    %cst_6 = arith.constant dense<0.000000e+00> : vector<8x288xf32>
    %5 = tpu.matmul %4, %2, %cst_6 {dimension_numbers = #tpu.dot_dimension_numbers<[1], [0], [0], [1], [0, 0, 1, 1], [], []>} : vector<8x8xbf16>, vector<8x288xbf16>, vector<8x288xf32> -> vector<8x288xf32>
    %6 = arith.addf %0, %5 : vector<8x288xf32>
    %c0_7 = arith.constant 0 : index
    %c0_8 = arith.constant 0 : index
    %c0_9 = arith.constant 0 : index
    %c1 = arith.constant 1 : index
    %7 = vector.load %arg3[%c0_7, %c0_8, %c0_9, %c1] : memref<1x1x8x326xbf16, #tpu.memory_space<vmem>>, vector<1x1x8x288xbf16>
    %8 = vector.shape_cast %7 : vector<1x1x8x288xbf16> to vector<8x288xbf16>
    %c1_10 = arith.constant 1 : index
    %c0_11 = arith.constant 0 : index
    %c0_12 = arith.constant 0 : index
    %9 = vector.load %arg2[%c1_10, %c0_11, %c0_12] : memref<9x8x8xbf16, #tpu.memory_space<vmem>>, vector<1x8x8xbf16>
    %10 = vector.shape_cast %9 : vector<1x8x8xbf16> to vector<8x8xbf16>
    %cst_13 = arith.constant dense<0.000000e+00> : vector<8x288xf32>
    %11 = tpu.matmul %10, %8, %cst_13 {dimension_numbers = #tpu.dot_dimension_numbers<[1], [0], [0], [1], [0, 0, 1, 1], [], []>} : vector<8x8xbf16>, vector<8x288xbf16>, vector<8x288xf32> -> vector<8x288xf32>
    %12 = arith.addf %6, %11 : vector<8x288xf32>
    %c0_14 = arith.constant 0 : index
    %c0_15 = arith.constant 0 : index
    %c0_16 = arith.constant 0 : index
    %c2 = arith.constant 2 : index
    %13 = vector.load %arg3[%c0_14, %c0_15, %c0_16, %c2] : memref<1x1x8x326xbf16, #tpu.memory_space<vmem>>, vector<1x1x8x288xbf16>
    %14 = vector.shape_cast %13 : vector<1x1x8x288xbf16> to vector<8x288xbf16>
    %c2_17 = arith.constant 2 : index
    %c0_18 = arith.constant 0 : index
    %c0_19 = arith.constant 0 : index
    %15 = vector.load %arg2[%c2_17, %c0_18, %c0_19] : memref<9x8x8xbf16, #tpu.memory_space<vmem>>, vector<1x8x8xbf16>
    %16 = vector.shape_cast %15 : vector<1x8x8xbf16> to vector<8x8xbf16>
    %cst_20 = arith.constant dense<0.000000e+00> : vector<8x288xf32>
    %17 = tpu.matmul %16, %14, %cst_20 {dimension_numbers = #tpu.dot_dimension_numbers<[1], [0], [0], [1], [0, 0, 1, 1], [], []>} : vector<8x8xbf16>, vector<8x288xbf16>, vector<8x288xf32> -> vector<8x288xf32>
    %18 = arith.addf %12, %17 : vector<8x288xf32>
    %c0_21 = arith.constant 0 : index
    %c0_22 = arith.constant 0 : index
    %c0_23 = arith.constant 0 : index
    %c18 = arith.constant 18 : index
    %19 = vector.load %arg3[%c0_21, %c0_22, %c0_23, %c18] : memref<1x1x8x326xbf16, #tpu.memory_space<vmem>>, vector<1x1x8x288xbf16>
    %20 = vector.shape_cast %19 : vector<1x1x8x288xbf16> to vector<8x288xbf16>
    %c3 = arith.constant 3 : index
    %c0_24 = arith.constant 0 : index
    %c0_25 = arith.constant 0 : index
    %21 = vector.load %arg2[%c3, %c0_24, %c0_25] : memref<9x8x8xbf16, #tpu.memory_space<vmem>>, vector<1x8x8xbf16>
    %22 = vector.shape_cast %21 : vector<1x8x8xbf16> to vector<8x8xbf16>
    %cst_26 = arith.constant dense<0.000000e+00> : vector<8x288xf32>
    %23 = tpu.matmul %22, %20, %cst_26 {dimension_numbers = #tpu.dot_dimension_numbers<[1], [0], [0], [1], [0, 0, 1, 1], [], []>} : vector<8x8xbf16>, vector<8x288xbf16>, vector<8x288xf32> -> vector<8x288xf32>
    %24 = arith.addf %18, %23 : vector<8x288xf32>
    %c0_27 = arith.constant 0 : index
    %c0_28 = arith.constant 0 : index
    %c0_29 = arith.constant 0 : index
    %c19 = arith.constant 19 : index
    %25 = vector.load %arg3[%c0_27, %c0_28, %c0_29, %c19] : memref<1x1x8x326xbf16, #tpu.memory_space<vmem>>, vector<1x1x8x288xbf16>
    %26 = vector.shape_cast %25 : vector<1x1x8x288xbf16> to vector<8x288xbf16>
    %c4 = arith.constant 4 : index
    %c0_30 = arith.constant 0 : index
    %c0_31 = arith.constant 0 : index
    %27 = vector.load %arg2[%c4, %c0_30, %c0_31] : memref<9x8x8xbf16, #tpu.memory_space<vmem>>, vector<1x8x8xbf16>
    %28 = vector.shape_cast %27 : vector<1x8x8xbf16> to vector<8x8xbf16>
    %cst_32 = arith.constant dense<0.000000e+00> : vector<8x288xf32>
    %29 = tpu.matmul %28, %26, %cst_32 {dimension_numbers = #tpu.dot_dimension_numbers<[1], [0], [0], [1], [0, 0, 1, 1], [], []>} : vector<8x8xbf16>, vector<8x288xbf16>, vector<8x288xf32> -> vector<8x288xf32>
    %30 = arith.addf %24, %29 : vector<8x288xf32>
    %c0_33 = arith.constant 0 : index
    %c0_34 = arith.constant 0 : index
    %c0_35 = arith.constant 0 : index
    %c20 = arith.constant 20 : index
    %31 = vector.load %arg3[%c0_33, %c0_34, %c0_35, %c20] : memref<1x1x8x326xbf16, #tpu.memory_space<vmem>>, vector<1x1x8x288xbf16>
    %32 = vector.shape_cast %31 : vector<1x1x8x288xbf16> to vector<8x288xbf16>
    %c5 = arith.constant 5 : index
    %c0_36 = arith.constant 0 : index
    %c0_37 = arith.constant 0 : index
    %33 = vector.load %arg2[%c5, %c0_36, %c0_37] : memref<9x8x8xbf16, #tpu.memory_space<vmem>>, vector<1x8x8xbf16>
    %34 = vector.shape_cast %33 : vector<1x8x8xbf16> to vector<8x8xbf16>
    %cst_38 = arith.constant dense<0.000000e+00> : vector<8x288xf32>
    %35 = tpu.matmul %34, %32, %cst_38 {dimension_numbers = #tpu.dot_dimension_numbers<[1], [0], [0], [1], [0, 0, 1, 1], [], []>} : vector<8x8xbf16>, vector<8x288xbf16>, vector<8x288xf32> -> vector<8x288xf32>
    %36 = arith.addf %30, %35 : vector<8x288xf32>
    %c0_39 = arith.constant 0 : index
    %c0_40 = arith.constant 0 : index
    %c0_41 = arith.constant 0 : index
    %c36 = arith.constant 36 : index
    %37 = vector.load %arg3[%c0_39, %c0_40, %c0_41, %c36] : memref<1x1x8x326xbf16, #tpu.memory_space<vmem>>, vector<1x1x8x288xbf16>
    %38 = vector.shape_cast %37 : vector<1x1x8x288xbf16> to vector<8x288xbf16>
    %c6 = arith.constant 6 : index
    %c0_42 = arith.constant 0 : index
    %c0_43 = arith.constant 0 : index
    %39 = vector.load %arg2[%c6, %c0_42, %c0_43] : memref<9x8x8xbf16, #tpu.memory_space<vmem>>, vector<1x8x8xbf16>
    %40 = vector.shape_cast %39 : vector<1x8x8xbf16> to vector<8x8xbf16>
    %cst_44 = arith.constant dense<0.000000e+00> : vector<8x288xf32>
    %41 = tpu.matmul %40, %38, %cst_44 {dimension_numbers = #tpu.dot_dimension_numbers<[1], [0], [0], [1], [0, 0, 1, 1], [], []>} : vector<8x8xbf16>, vector<8x288xbf16>, vector<8x288xf32> -> vector<8x288xf32>
    %42 = arith.addf %36, %41 : vector<8x288xf32>
    %c0_45 = arith.constant 0 : index
    %c0_46 = arith.constant 0 : index
    %c0_47 = arith.constant 0 : index
    %c37 = arith.constant 37 : index
    %43 = vector.load %arg3[%c0_45, %c0_46, %c0_47, %c37] : memref<1x1x8x326xbf16, #tpu.memory_space<vmem>>, vector<1x1x8x288xbf16>
    %44 = vector.shape_cast %43 : vector<1x1x8x288xbf16> to vector<8x288xbf16>
    %c7 = arith.constant 7 : index
    %c0_48 = arith.constant 0 : index
    %c0_49 = arith.constant 0 : index
    %45 = vector.load %arg2[%c7, %c0_48, %c0_49] : memref<9x8x8xbf16, #tpu.memory_space<vmem>>, vector<1x8x8xbf16>
    %46 = vector.shape_cast %45 : vector<1x8x8xbf16> to vector<8x8xbf16>
    %cst_50 = arith.constant dense<0.000000e+00> : vector<8x288xf32>
    %47 = tpu.matmul %46, %44, %cst_50 {dimension_numbers = #tpu.dot_dimension_numbers<[1], [0], [0], [1], [0, 0, 1, 1], [], []>} : vector<8x8xbf16>, vector<8x288xbf16>, vector<8x288xf32> -> vector<8x288xf32>
    %48 = arith.addf %42, %47 : vector<8x288xf32>
    %c0_51 = arith.constant 0 : index
    %c0_52 = arith.constant 0 : index
    %c0_53 = arith.constant 0 : index
    %c38 = arith.constant 38 : index
    %49 = vector.load %arg3[%c0_51, %c0_52, %c0_53, %c38] : memref<1x1x8x326xbf16, #tpu.memory_space<vmem>>, vector<1x1x8x288xbf16>
    %50 = vector.shape_cast %49 : vector<1x1x8x288xbf16> to vector<8x288xbf16>
    %c8 = arith.constant 8 : index
    %c0_54 = arith.constant 0 : index
    %c0_55 = arith.constant 0 : index
    %51 = vector.load %arg2[%c8, %c0_54, %c0_55] : memref<9x8x8xbf16, #tpu.memory_space<vmem>>, vector<1x8x8xbf16>
    %52 = vector.shape_cast %51 : vector<1x8x8xbf16> to vector<8x8xbf16>
    %cst_56 = arith.constant dense<0.000000e+00> : vector<8x288xf32>
    %53 = tpu.matmul %52, %50, %cst_56 {dimension_numbers = #tpu.dot_dimension_numbers<[1], [0], [0], [1], [0, 0, 1, 1], [], []>} : vector<8x8xbf16>, vector<8x288xbf16>, vector<8x288xf32> -> vector<8x288xf32>
    %54 = arith.addf %48, %53 : vector<8x288xf32>
    %c0_57 = arith.constant 0 : index
    %c0_58 = arith.constant 0 : index
    %55 = vector.load %arg4[%c0_57, %c0_58] : memref<8x1xf32, #tpu.memory_space<vmem>>, vector<8x1xf32>
    %56 = vector.broadcast %55 : vector<8x1xf32> to vector<8x288xf32>
    %57 = arith.addf %54, %56 : vector<8x288xf32>
    %c0_59 = arith.constant 0 : index
    %c0_60 = arith.constant 0 : index
    %c0_61 = arith.constant 0 : index
    %58 = vector.load %arg5[%c0_59, %c0_60, %c0_61] : memref<1x8x288xf32, #tpu.memory_space<vmem>>, vector<1x8x288xf32>
    %59 = vector.shape_cast %58 : vector<1x8x288xf32> to vector<8x288xf32>
    %60 = vector.shape_cast %57 : vector<8x288xf32> to vector<1x8x288xf32>
    tpu.vector_store %arg5[%c0_59, %c0_60, %c0_61], %60 {strides = array<i32>} : memref<1x8x288xf32, #tpu.memory_space<vmem>>, vector<1x8x288xf32>,
    return
  }
  func.func @transform_0(%arg0: i32, %arg1: i32) -> (i32, i32, i32) {
    %c0_i32 = arith.constant 0 : i32
    %c0_i32_0 = arith.constant 0 : i32
    %c0_i32_1 = arith.constant 0 : i32
    %c0_i32_2 = arith.constant 0 : i32
    return %c0_i32, %c0_i32_0, %c0_i32_1 : i32, i32, i32
  }
  func.func @transform_1(%arg0: i32, %arg1: i32) -> (i32, i32, i32, i32) {
    %c0_i32 = arith.constant 0 : i32
    %c0_i32_0 = arith.constant 0 : i32
    %c0_i32_1 = arith.constant 0 : i32
    return %arg0, %arg1, %c0_i32, %c0_i32_0 : i32, i32, i32, i32
  }
  func.func @transform_2(%arg0: i32, %arg1: i32) -> (i32, i32) {
    %c0_i32 = arith.constant 0 : i32
    %c0_i32_0 = arith.constant 0 : i32
    %c0_i32_1 = arith.constant 0 : i32
    return %c0_i32, %c0_i32_0 : i32, i32
  }
  func.func @transform_3(%arg0: i32, %arg1: i32) -> (i32, i32, i32) {
    %c0_i32 = arith.constant 0 : i32
    %c0_i32_0 = arith.constant 0 : i32
    return %arg0, %c0_i32, %arg1 : i32, i32, i32
  }
}

</mosaic_0001>

<bundles_post_ra>
// kernel: grid_feature_conv2d.1
= control target key start
LH: loop header
LB: loop body
LE: loop exit
PB: predicated region body
PF: predicated region fallthrough
CT: control target
= control target key end

     0   :  { %s1486_s12 = smov 0   ;;  %s1488_s13 = smov 0   ;;  %s1637_s0 = inlined_call_operand.vmem [shape: bf16[9,8,8], index: 0, kind: input, shape index: {}]   ;;  %s1638_s1 = inlined_call_operand.vmem [shape: bf16[2,1,8,326], index: 1, kind: input, shape index: {}]   ;;  %s1639_s2 = inlined_call_operand.vmem [shape: f32[8,1], index: 2, kind: input, shape index: {}]   ;;  %s1640_s3 = inlined_call_operand.vmem [shape: f32[2,8,288], index: 3, kind: output, shape index: {}]  }
   0x1   :  { %s1490_s14 = smov 0  }
   0x2 LB: > { %s25_s15 = sadd.s32 1, %s1449_s13  ;;  %p1275_p0 = scmp.ge.s32.totalorder %s1453_s14, 1  ;;  %s1453_s14 = sphi %s1490_s14, %s13_s14   ;;  %s1449_s13 = sphi %s1488_s13, %s1642_s13   ;;  %s1445_s12 = sphi %s1486_s12, %s1641_s12  }
   0x3   : > { %p27_p1 = scmp.ge.s32.totalorder %s25_s15, 2  ;;  %p157_p2 = scmp.lt.s32.totalorder %s1453_s14, 3 }
   0x5   : > { %s1644_s15 = smov (%p27_p1, %s25_s15), 0  ;;  %p158_p3 = pnand %p1275_p0, %p157_p2 }
   0x6   : > { %p189_p4 = scmp.lt.s32.totalorder (!%p158_p3), %s1445_s12, 1  ;;  %s1458_s20 = smov (!%p158_p3), 127  }
   0x7   : > { %161 = sbr.rel (%p158_p3) target bundleno = 407 (0x197), region = 32  ;;  %s1459_s21 = smov (!%p158_p3), 126  }
   0x8   : > { %s1460_s22 = smov (!%p158_p3), 110   ;;  %s1461_s23 = smov (!%p158_p3), 109  }
   0x9   : > { %s1462_s24 = smov (!%p158_p3), 108   ;;  %s1463_s25 = smov (!%p158_p3), 92  }
   0xa   : > { %s1464_s26 = smov (!%p158_p3), 91   ;;  %s1465_s27 = smov (!%p158_p3), 90  }
   0xc   : > { %v1455_v0 = vmov 0.0   ;;  %vm1456_vm0 = vmmov 0   ;;  %s1646_s12 = smov (!%p189_p4, %s1445_s12), 1  ;;  %v1457_v1 = vmov 0   ;;  %v1168_v6 = vld [vmem:[%s1639_s2] sm:$0xff]  ;;  %vm235_vm1 = vcmask 1043456  }
   0xd   : > { %1336 = vmatprep.subr.bf16.mxu1 %v1455_v0  ;;  %1338 = vmatprep.mubr.msk.bf16.mxu1 %vm1456_vm0, %v1455_v0  ;;  %s1390_s16 = smul.u32 12, %s1646_s12  ;;  %v1278_v10 = vld [vmem:[%s1637_s0 + $0x4] sm:$0xf]  ;;  %vm231_vm2 = vcmask 64512   ;;  %vm228_vm3 = vcmask 1039360   ;;  %vm427_vm4 = vcmask 1031168  }
   0xe   : > { %277 = vmatprep.mubr.bf16.mxu0 %v1457_v1  ;;  %1427 = vset.pattern.permute.xlu0 %v1457_v1  ;;  %v211_v20 = vld [vmem:[%s1637_s0] sm:$0xf]  ;;  %vm534_vm5 = vcmask 900096   ;;  %v1288_v29 = vld [vmem:[%s1637_s0 + $0x8] sm:$0xf]  ;;  %vm641_vm6 = vcmask 891904  }
   0xf   : > { %s197_s19 = scalar_lea.vmem %s1638_s1, %s1390_s16  ;;  %v1292_v37 = vld [vmem:[%s1637_s0 + $0xc] sm:$0xf]  ;;  %vm748_vm7 = vcmask 883712   ;;  %v1296_v45 = vld [vmem:[%s1637_s0 + $0x10] sm:$0xf]  ;;  %vm855_vm8 = vcmask 752640  }
  0x10   : > { %v1428_v2 = vld [vmem:[%s197_s19 + $0x8] ss:$0 sps:$4 sm:$0xff]   ;;  %v209_v3 = vld [vmem:[%s197_s19] sm:$0xff]  ;;  %v1300_v53 = vld [vmem:[%s1637_s0 + $0x14] sm:$0xf]  ;;  %vm962_vm9 = vcmask 744448  }
  0x11   : > { %v1279_v4 = vcombine.low %v209_v3, %v209_v3  ;;  %226 = vrot.lane.b32.xlu1 %v1428_v2, %s1458_s20  ;;  %v1280_v5 = vcombine.high %v209_v3, %v209_v3  ;;  %v336_v11 = vsel %vm235_vm1, %v1428_v2, 0  ;;  %v1304_v61 = vld [vmem:[%s1637_s0 + $0x18] sm:$0xf]  ;;  %vm1069_vm10 = vcmask 736256  }
  0x12   : > { %vm1179_vm11 = vcmask 261120  }
  0x13   : > { %222 = vrot.lane.b32.xlu0 %v1279_v4, %s1458_s20  ;;  %v330_v18 = vsel %vm235_vm1, %v1279_v4, 0 }
  0x15   : > { %421 = vrot.lane.b32.xlu1 %v1279_v4, %s1459_s21 }
  0x17   : > { %224 = vrot.lane.b32.xlu0 %v1280_v5, %s1458_s20 }
  0x19   : > { %425 = vrot.lane.b32.xlu1 %v1428_v2, %s1459_s21 }
  0x1b   : > { %423 = vrot.lane.b32.xlu0 %v1280_v5, %s1459_s21 }
  0x1d   : > { %530 = vrot.lane.b32.xlu1 %v1280_v5, %s1460_s22 }
  0x1f   : > { %528 = vrot.lane.b32.xlu0 %v1279_v4, %s1460_s22 }
  0x21   : > { %635 = vrot.lane.b32.xlu1 %v1279_v4, %s1461_s23 }
  0x23   : > { %532 = vrot.lane.b32.xlu0 %v1428_v2, %s1460_s22 }
  0x25   : > { %639 = vrot.lane.b32.xlu1 %v1428_v2, %s1461_s23 }
  0x27   : > { %637 = vrot.lane.b32.xlu0 %v1280_v5, %s1461_s23 }
  0x29   : > { %744 = vrot.lane.b32.xlu1 %v1280_v5, %s1462_s24 }
  0x2b   : > { %742 = vrot.lane.b32.xlu0 %v1279_v4, %s1462_s24 }
  0x2d   : > { %849 = vrot.lane.b32.xlu1 %v1279_v4, %s1463_s25 }
  0x2f   : > { %746 = vrot.lane.b32.xlu0 %v1428_v2, %s1462_s24 }
  0x31   : > { %853 = vrot.lane.b32.xlu1 %v1428_v2, %s1463_s25 }
  0x33   : > { %851 = vrot.lane.b32.xlu0 %v1280_v5, %s1463_s25  ;;  %s1391_s25 = smul.u32 24, %s1646_s12 }
  0x35   : > { %958 = vrot.lane.b32.xlu1 %v1280_v5, %s1464_s26  ;;  %s206_s28 = scalar_lea.vmem %s1640_s3, %s1391_s25 }
  0x37   : > { %956 = vrot.lane.b32.xlu0 %v1279_v4, %s1464_s26 }
  0x39   : > { %1063 = vrot.lane.b32.xlu1 %v1279_v4, %s1465_s27 }
  0x3b   : > { %960 = vrot.lane.b32.xlu0 %v1428_v2, %s1464_s26 }
  0x3d   : > { %1067 = vrot.lane.b32.xlu1 %v1428_v2, %s1465_s27 }
  0x3f   : > { %1065 = vrot.lane.b32.xlu0 %v1280_v5, %s1465_s27 }
  0x43   : > { %1171 = vperm.xlu0 %1427, %v1168_v6   ;;  %v1308_v6 = vld [vmem:[%s1637_s0 + $0x1c] sm:$0xf] }
  0x83   : > { %v227_v7 = vpop.permute.xlu1 %226 }
  0x84   : > { %v243_v9 = vsel %vm235_vm1, %v227_v7, 0 }
  0x85   : > { %v223_v8 = vpop.permute.xlu0 %222  ;;  %1337 = vmatpush3.bf16.msra.mxu1 %v243_v9 }
  0x86   : > { %1342 = vmatprep.subr.bf16.mxu1 %v1455_v0 }
  0x87   : > { %v422_v12 = vpop.permute.xlu1 %421 }
  0x88   : > { %1339 = vmatmul.mubr.msk.bf16.vlgmr.msra.gmra.mxu1 %vm231_vm2, %v1278_v10 }
  0x89   : > { %v225_v13 = vpop.permute.xlu0 %224  ;;  %1343 = vmatpush3.bf16.msra.mxu1 %v336_v11  ;;  %1344 = vmatprep.mubr.msk.bf16.mxu1 %vm1456_vm0, %v1455_v0  ;;  %v1312_v11 = vld [vmem:[%s1637_s0 + $0x20] sm:$0xf] }
  0x8a   : > { %v230_v14 = vsel %vm228_vm3, %v225_v13, %v227_v7  ;;  %v229_v15 = vsel %vm228_vm3, %v223_v8, %v225_v13  ;;  %1348 = vmatprep.subr.bf16.mxu1 %v1455_v0 }
  0x8b   : > { %1282 = vmatprep.subr.msk.bf16.mxu0 %vm235_vm1, %v230_v14  ;;  %v237_v16 = vsel %vm235_vm1, %v229_v15, 0  ;;  %v426_v17 = vpop.permute.xlu1 %425 }
  0x8c   : > { %260 = vmatpush1.bf16.msra.mxu0 %v237_v16  ;;  %v440_v22 = vsel %vm235_vm1, %v426_v17, 0 }
  0x8d   : > { %1285 = vmatprep.subr.msk.bf16.mxu0 %vm235_vm1, %v1280_v5  ;;  %v424_v19 = vpop.permute.xlu0 %423 }
  0x8e   : > { %v429_v21 = vsel %vm427_vm4, %v424_v19, %v426_v17  ;;  %v428_v25 = vsel %vm427_vm4, %v422_v12, %v424_v19 }
  0x8f   : > { %1283 = vmatmul.mubr.msk.bf16.vlgmr.msra.gmra.mxu0 %vm231_vm2, %v1278_v10  ;;  %v531_v23 = vpop.permute.xlu1 %530  ;;  %v434_v26 = vsel %vm235_vm1, %v428_v25, 0 }
  0x90   : > { %353 = vmatpush1.bf16.msra.mxu0 %v330_v18  ;;  %370 = vmatprep.mubr.bf16.mxu0 %v1457_v1 }
  0x91   : > { %1345 = vmatmul.mubr.msk.bf16.vlgmr.msra.gmra.mxu1 %vm231_vm2, %v211_v20  ;;  %1289 = vmatprep.subr.msk.bf16.mxu0 %vm235_vm1, %v429_v21  ;;  %v529_v24 = vpop.permute.xlu0 %528 }
  0x92   : > { %1349 = vmatpush3.bf16.msra.mxu1 %v440_v22  ;;  %1350 = vmatprep.mubr.msk.bf16.mxu1 %vm1456_vm0, %v1455_v0  ;;  %v535_v33 = vsel %vm534_vm5, %v529_v24, %v531_v23 }
  0x93   : > { %1354 = vmatprep.subr.bf16.mxu1 %v1455_v0  ;;  %v636_v28 = vpop.permute.xlu1 %635  ;;  %v541_v35 = vsel %vm235_vm1, %v535_v33, 0 }
  0x95   : > { %v533_v27 = vpop.permute.xlu0 %532 }
  0x96   : > { %v536_v30 = vsel %vm534_vm5, %v531_v23, %v533_v27  ;;  %v547_v31 = vsel %vm235_vm1, %v533_v27, 0 }
  0x97   : > { %1286 = vmatmul.mubr.msk.bf16.vlgmr.msra.gmra.mxu0 %vm231_vm2, %v211_v20  ;;  %v640_v34 = vpop.permute.xlu1 %639 }
  0x98   : > { %457 = vmatpush1.bf16.msra.mxu0 %v434_v26  ;;  %474 = vmatprep.mubr.bf16.mxu0 %v1457_v1  ;;  %v654_v39 = vsel %vm235_vm1, %v640_v34, 0 }
  0x99   : > { %1351 = vmatmul.mubr.msk.bf16.vlgmr.msra.gmra.mxu1 %vm231_vm2, %v1288_v29  ;;  %1293 = vmatprep.subr.msk.bf16.mxu0 %vm235_vm1, %v536_v30  ;;  %v638_v32 = vpop.permute.xlu0 %637 }
  0x9a   : > { %1355 = vmatpush3.bf16.msra.mxu1 %v547_v31  ;;  %1356 = vmatprep.mubr.msk.bf16.mxu1 %vm1456_vm0, %v1455_v0  ;;  %v643_v38 = vsel %vm641_vm6, %v638_v32, %v640_v34  ;;  %v642_v41 = vsel %vm641_vm6, %v636_v28, %v638_v32 }
  0x9b   : > { %1360 = vmatprep.subr.bf16.mxu1 %v1455_v0  ;;  %v745_v40 = vpop.permute.xlu1 %744  ;;  %v648_v43 = vsel %vm235_vm1, %v642_v41, 0 }
  0x9d   : > { %v743_v36 = vpop.permute.xlu0 %742 }
  0x9e   : > { %v749_v49 = vsel %vm748_vm7, %v743_v36, %v745_v40 }
  0x9f   : > { %1290 = vmatmul.mubr.msk.bf16.vlgmr.msra.gmra.mxu0 %vm231_vm2, %v1288_v29  ;;  %v850_v44 = vpop.permute.xlu1 %849  ;;  %v755_v51 = vsel %vm235_vm1, %v749_v49, 0 }
  0xa0   : > { %564 = vmatpush1.bf16.msra.mxu0 %v541_v35  ;;  %581 = vmatprep.mubr.bf16.mxu0 %v1457_v1 }
  0xa1   : > { %1357 = vmatmul.mubr.msk.bf16.vlgmr.msra.gmra.mxu1 %vm231_vm2, %v1292_v37  ;;  %1297 = vmatprep.subr.msk.bf16.mxu0 %vm235_vm1, %v643_v38  ;;  %v747_v42 = vpop.permute.xlu0 %746 }
  0xa2   : > { %1361 = vmatpush3.bf16.msra.mxu1 %v654_v39  ;;  %1362 = vmatprep.mubr.msk.bf16.mxu1 %vm1456_vm0, %v1455_v0  ;;  %v750_v46 = vsel %vm748_vm7, %v745_v40, %v747_v42  ;;  %v761_v47 = vsel %vm235_vm1, %v747_v42, 0 }
  0xa3   : > { %1366 = vmatprep.subr.bf16.mxu1 %v1455_v0  ;;  %v854_v50 = vpop.permute.xlu1 %853 }
  0xa4   : > { %v868_v55 = vsel %vm235_vm1, %v854_v50, 0 }
  0xa5   : > { %v852_v48 = vpop.permute.xlu0 %851 }
  0xa6   : > { %v857_v54 = vsel %vm855_vm8, %v852_v48, %v854_v50  ;;  %v856_v57 = vsel %vm855_vm8, %v850_v44, %v852_v48 }
  0xa7   : > { %1294 = vmatmul.mubr.msk.bf16.vlgmr.msra.gmra.mxu0 %vm231_vm2, %v1292_v37  ;;  %v959_v56 = vpop.permute.xlu1 %958  ;;  %v862_v59 = vsel %vm235_vm1, %v856_v57, 0 }
  0xa8   : > { %671 = vmatpush1.bf16.msra.mxu0 %v648_v43  ;;  %688 = vmatprep.mubr.bf16.mxu0 %v1457_v1 }
  0xa9   : > { %1363 = vmatmul.mubr.msk.bf16.vlgmr.msra.gmra.mxu1 %vm231_vm2, %v1296_v45  ;;  %1301 = vmatprep.subr.msk.bf16.mxu0 %vm235_vm1, %v750_v46  ;;  %v957_v52 = vpop.permute.xlu0 %956 }
  0xaa   : > { %1367 = vmatpush3.bf16.msra.mxu1 %v761_v47  ;;  %1368 = vmatprep.mubr.msk.bf16.mxu1 %vm1456_vm0, %v1455_v0  ;;  %v963_v2 = vsel %vm962_vm9, %v957_v52, %v959_v56 }
  0xab   : > { %1372 = vmatprep.subr.bf16.mxu1 %v1455_v0  ;;  %v1064_v60 = vpop.permute.xlu1 %1063  ;;  %v969_v5 = vsel %vm235_vm1, %v963_v2, 0 }
  0xad   : > { %v961_v58 = vpop.permute.xlu0 %960 }
  0xae   : > { %v964_v62 = vsel %vm962_vm9, %v959_v56, %v961_v58  ;;  %v975_v63 = vsel %vm235_vm1, %v961_v58, 0 }
  0xaf   : > { %1298 = vmatmul.mubr.msk.bf16.vlgmr.msra.gmra.mxu0 %vm231_vm2, %v1296_v45  ;;  %v1068_v4 = vpop.permute.xlu1 %1067 }
  0xb0   : > { %778 = vmatpush1.bf16.msra.mxu0 %v755_v51  ;;  %795 = vmatprep.mubr.bf16.mxu0 %v1457_v1  ;;  %v1082_v8 = vsel %vm235_vm1, %v1068_v4, 0 }
  0xb1   : > { %1369 = vmatmul.mubr.msk.bf16.vlgmr.msra.gmra.mxu1 %vm231_vm2, %v1300_v53  ;;  %1305 = vmatprep.subr.msk.bf16.mxu0 %vm235_vm1, %v857_v54  ;;  %v1066_v3 = vpop.permute.xlu0 %1065 }
  0xb2   : > { %1373 = vmatpush3.bf16.msra.mxu1 %v868_v55  ;;  %1374 = vmatprep.mubr.msk.bf16.mxu1 %vm1456_vm0, %v1455_v0  ;;  %v1071_v7 = vsel %vm1069_vm10, %v1066_v3, %v1068_v4  ;;  %v1070_v9 = vsel %vm1069_vm10, %v1064_v60, %v1066_v3 }
  0xb3   : > { %1378 = vmatprep.subr.bf16.mxu1 %v1455_v0  ;;  %v1076_v10 = vsel %vm235_vm1, %v1070_v9, 0 }
  0xb7   : > { %1302 = vmatmul.mubr.msk.bf16.vlgmr.msra.gmra.mxu0 %vm231_vm2, %v1300_v53 }
  0xb8   : > { %885 = vmatpush1.bf16.msra.mxu0 %v862_v59  ;;  %902 = vmatprep.mubr.bf16.mxu0 %v1457_v1 }
  0xb9   : > { %1375 = vmatmul.mubr.msk.bf16.vlgmr.msra.gmra.mxu1 %vm231_vm2, %v1304_v61  ;;  %1309 = vmatprep.subr.msk.bf16.mxu0 %vm235_vm1, %v964_v62 }
  0xba   : > { %1379 = vmatpush3.bf16.msra.mxu1 %v975_v63  ;;  %1380 = vmatprep.mubr.msk.bf16.mxu1 %vm1456_vm0, %v1455_v0 }
  0xbb   : > { %1384 = vmatprep.subr.bf16.mxu1 %v1455_v0 }
  0xbf   : > { %1306 = vmatmul.mubr.msk.bf16.vlgmr.msra.gmra.mxu0 %vm231_vm2, %v1304_v61 }
  0xc0   : > { %992 = vmatpush1.bf16.msra.mxu0 %v969_v5  ;;  %1009 = vmatprep.mubr.bf16.mxu0 %v1457_v1 }
  0xc1   : > { %1381 = vmatmul.mubr.msk.bf16.vlgmr.msra.gmra.mxu1 %vm231_vm2, %v1308_v6  ;;  %1313 = vmatprep.subr.msk.bf16.mxu0 %vm235_vm1, %v1071_v7 }
  0xc2   : > { %1385 = vmatpush3.bf16.msra.mxu1 %v1082_v8  ;;  %1386 = vmatprep.mubr.msk.bf16.mxu1 %vm1456_vm0, %v1455_v0 }
  0xc7   : > { %1310 = vmatmul.mubr.msk.bf16.vlgmr.msra.gmra.mxu0 %vm231_vm2, %v1308_v6 }
  0xc8   : > { %1099 = vmatpush1.bf16.msra.mxu0 %v1076_v10  ;;  %1116 = vmatprep.mubr.bf16.mxu0 %v1457_v1 }
  0xc9   : > { %1387 = vmatmul.mubr.msk.bf16.vlgmr.msra.gmra.mxu1 %vm231_vm2, %v1312_v11 }
  0xcf   : > { %1314 = vmatmul.mubr.msk.bf16.vlgmr.msra.gmra.mxu0 %vm231_vm2, %v1312_v11 }
 0x148   : > { %v320_v12 = vpop.f32.mrf.mxu1 }
 0x14a   : > { %v1340_v13 = vpop.f32.mrf.mxu1 }
 0x14c   : > { %v323_v14 = vpop.f32.mrf.mxu1 }
 0x14e   : > { %v1341_v0 = vpop.f32.mrf.mxu1 }
 0x14f   : > { %v279_v15 = vpop.f32.mrf.mxu0 }
 0x151   : > { %v281_v16 = vpop.f32.mrf.mxu0  ;;  %v413_v17 = vpop.f32.mrf.mxu1 }
 0x152   : > { %v414_v59 = vadd.f32 %v413_v17, %v320_v12 }
 0x153   : > { %v283_v18 = vpop.f32.mrf.mxu0  ;;  %v1346_v19 = vpop.f32.mrf.mxu1 }
 0x155   : > { %v284_v20 = vpop.f32.mrf.mxu0  ;;  %v416_v21 = vpop.f32.mrf.mxu1 }
 0x157   : > { %v372_v22 = vpop.f32.mrf.mxu0  ;;  %v1347_v23 = vpop.f32.mrf.mxu1 }
 0x158   : > { %v373_v6 = vadd.f32 %v372_v22, %v279_v15 }
 0x159   : > { %v374_v24 = vpop.f32.mrf.mxu0  ;;  %v517_v25 = vpop.f32.mrf.mxu1 }
 0x15a   : > { %v525_v62 = vadd.f32 %v517_v25, %v414_v59  ;;  %v375_v10 = vadd.f32 %v374_v24, %v281_v16 }
 0x15b   : > { %v376_v1 = vpop.f32.mrf.mxu0  ;;  %v1352_v26 = vpop.f32.mrf.mxu1 }
 0x15c   : > { %v1172_v1 = vpop.permute.xlu0 %1171 }
 0x15d   : > { %v377_v27 = vpop.f32.mrf.mxu0  ;;  %v520_v28 = vpop.f32.mrf.mxu1 }
 0x15f   : > { %v476_v29 = vpop.f32.mrf.mxu0  ;;  %v1353_v30 = vpop.f32.mrf.mxu1 }
 0x160   : > { %v523_v11 = vadd.f32 %v476_v29, %v373_v6 }
 0x161   : > { %v478_v31 = vpop.f32.mrf.mxu0  ;;  %v624_v32 = vpop.f32.mrf.mxu1 }
 0x162   : > { %v632_v3 = vadd.f32 %v624_v32, %v525_v62  ;;  %v524_v18 = vadd.f32 %v478_v31, %v375_v10 }
 0x163   : > { %v480_v33 = vpop.f32.mrf.mxu0  ;;  %v1358_v34 = vpop.f32.mrf.mxu1 }
 0x165   : > { %v481_v35 = vpop.f32.mrf.mxu0  ;;  %v627_v36 = vpop.f32.mrf.mxu1 }
 0x167   : > { %v583_v37 = vpop.f32.mrf.mxu0  ;;  %v1359_v38 = vpop.f32.mrf.mxu1 }
 0x168   : > { %v630_v12 = vadd.f32 %v583_v37, %v523_v11 }
 0x169   : > { %v585_v39 = vpop.f32.mrf.mxu0  ;;  %v731_v40 = vpop.f32.mrf.mxu1 }
 0x16a   : > { %v739_v7 = vadd.f32 %v731_v40, %v632_v3  ;;  %v631_v21 = vadd.f32 %v585_v39, %v524_v18 }
 0x16b   : > { %v587_v41 = vpop.f32.mrf.mxu0  ;;  %v1364_v42 = vpop.f32.mrf.mxu1 }
 0x16d   : > { %v588_v43 = vpop.f32.mrf.mxu0  ;;  %v734_v44 = vpop.f32.mrf.mxu1 }
 0x16f   : > { %v690_v45 = vpop.f32.mrf.mxu0  ;;  %v1365_v46 = vpop.f32.mrf.mxu1 }
 0x170   : > { %v737_v23 = vadd.f32 %v690_v45, %v630_v12 }
 0x171   : > { %v692_v47 = vpop.f32.mrf.mxu0  ;;  %v838_v48 = vpop.f32.mrf.mxu1 }
 0x172   : > { %v846_v13 = vadd.f32 %v838_v48, %v739_v7  ;;  %v738_v22 = vadd.f32 %v692_v47, %v631_v21 }
 0x173   : > { %v694_v49 = vpop.f32.mrf.mxu0  ;;  %v1370_v50 = vpop.f32.mrf.mxu1 }
 0x175   : > { %v695_v51 = vpop.f32.mrf.mxu0  ;;  %v841_v52 = vpop.f32.mrf.mxu1 }
 0x177   : > { %v797_v53 = vpop.f32.mrf.mxu0  ;;  %v1371_v54 = vpop.f32.mrf.mxu1 }
 0x178   : > { %v844_v27 = vadd.f32 %v797_v53, %v737_v23 }
 0x179   : > { %v799_v55 = vpop.f32.mrf.mxu0  ;;  %v945_v56 = vpop.f32.mrf.mxu1 }
 0x17a   : > { %v953_v17 = vadd.f32 %v945_v56, %v846_v13  ;;  %v845_v29 = vadd.f32 %v799_v55, %v738_v22 }
 0x17b   : > { %v801_v57 = vpop.f32.mrf.mxu0  ;;  %v1376_v58 = vpop.f32.mrf.mxu1 }
 0x17d   : > { %v802_v60 = vpop.f32.mrf.mxu0  ;;  %v948_v61 = vpop.f32.mrf.mxu1 }
 0x17f   : > { %v904_v63 = vpop.f32.mrf.mxu0  ;;  %v1377_v2 = vpop.f32.mrf.mxu1 }
 0x180   : > { %v951_v30 = vadd.f32 %v904_v63, %v844_v27 }
 0x181   : > { %v906_v4 = vpop.f32.mrf.mxu0  ;;  %v1052_v5 = vpop.f32.mrf.mxu1 }
 0x182   : > { %v1060_v25 = vadd.f32 %v1052_v5, %v953_v17  ;;  %v952_v34 = vadd.f32 %v906_v4, %v845_v29 }
 0x183   : > { %v908_v8 = vpop.f32.mrf.mxu0  ;;  %v1382_v9 = vpop.f32.mrf.mxu1 }
 0x185   : > { %v909_v14 = vpop.f32.mrf.mxu0  ;;  %v1055_v0 = vpop.f32.mrf.mxu1 }
 0x187   : > { %v1011_v19 = vpop.f32.mrf.mxu0  ;;  %v1383_v20 = vpop.f32.mrf.mxu1 }
 0x188   : > { %v1058_v35 = vadd.f32 %v1011_v19, %v951_v30 }
 0x189   : > { %v1013_v26 = vpop.f32.mrf.mxu0  ;;  %v1159_v15 = vpop.f32.mrf.mxu1 }
 0x18a   : > { %v1167_v28 = vadd.f32 %v1159_v15, %v1060_v25  ;;  %v1059_v38 = vadd.f32 %v1013_v26, %v952_v34 }
 0x18b   : > { %v1015_v16 = vpop.f32.mrf.mxu0  ;;  %v1388_v24 = vpop.f32.mrf.mxu1 }
 0x18c   : > { %v1176_v31 = vadd.f32 %v1172_v1, %v1167_v28 }
 0x18d   : > { %v1016_v32 = vpop.f32.mrf.mxu0  ;;  %v1162_v33 = vpop.f32.mrf.mxu1 }
 0x18e   : > { %1180 = vst.msk [vmem:[%s206_s28 + $0x10] sm:$0xff] %vm1179_vm11, %v1176_v31 }
 0x18f   : > { %v1118_v36 = vpop.f32.mrf.mxu0  ;;  %v1389_v37 = vpop.f32.mrf.mxu1 }
 0x190   : > { %v1165_v39 = vadd.f32 %v1118_v36, %v1058_v35 }
 0x191   : > { %v1120_v40 = vpop.f32.mrf.mxu0 }
 0x192   : > { %v1174_v41 = vadd.f32 %v1172_v1, %v1165_v39  ;;  %v1166_v42 = vadd.f32 %v1120_v40, %v1059_v38 }
 0x193   : > { %v1122_v43 = vpop.f32.mrf.mxu0 }
 0x194   : > { %1177 = vst [vmem:[%s206_s28] sm:$0xff] %v1174_v41  ;;  %v1175_v44 = vadd.f32 %v1172_v1, %v1166_v42 }
 0x195   : > { %v1123_v45 = vpop.f32.mrf.mxu0 }
 0x196   : > { %1178 = vst [vmem:[%s206_s28 + $0x8] sm:$0xff] %v1175_v44 }
 0x197 PF: > { %s13_s14 = sadd.s32 1, %s1453_s14   ;;  %s1641_s12 = smov %s1449_s13 }
 0x198   : > { %p10_p5 = scmp.ge.s32.totalorder %s13_s14, 4   ;;  %s1642_s13 = smov %s1644_s15 }
 0x19a   :  { %12 = sbr.rel (!%p10_p5) target bundleno = 2 (0x2), region = 70 }

</bundles_post_ra>
